<compile_context>
chip_gen: v7x
topology: tpu7x:2x2x1
jax: 0.10.0
libtpu: 0.0.40
codegen_flags: <defaults>
</compile_context>

<pallas_src>
import numpy as np
import jax
import jax.numpy as jnp
from jax.experimental import pallas as pl
from jax.experimental.pallas import tpu as pltpu

WINDOW_SIZE = 11
SIGMA = 1.5              # hard-coded in create_window()
_C1 = 0.01 ** 2
_C2 = 0.03 ** 2
_VMEM_BUDGET = 10 * 1024 * 1024   # stay under the smallest scoped default (v5e: 16 MiB)


def _gaussian_1d(window_size: int, sigma: float) -> np.ndarray:
    x = np.arange(window_size, dtype=np.float64)
    g = np.exp(-((x - window_size // 2) ** 2) / (2.0 * sigma ** 2))
    return (g / g.sum()).astype(np.float32)


def _banded_conv_matrix(out_dim: int, in_dim: int, taps: np.ndarray) -> np.ndarray:
    """A[i, i+k] = taps[k]  =>  (A @ x)[i] = sum_k taps[k] * x[i+k]  (valid conv)."""
    a = np.zeros((out_dim, in_dim), np.float32)
    k = taps.shape[0]
    for i in range(out_dim):
        a[i, i:i + k] = taps
    return a


def _block_diag(block: np.ndarray, n: int) -> np.ndarray:
    r, c = block.shape
    out = np.zeros((n * r, n * c), np.float32)
    for i in range(n):
        out[i * r:(i + 1) * r, i * c:(i + 1) * c] = block
    return out


def _choose_planes_per_step(bc: int, h: int, w: int, oh: int, ow: int,
                            itemsize: int) -> int:
    """Largest divisor P of bc whose per-step working set fits the VMEM budget
    and whose lane-packed block width P*w respects the (8,128) tiling rule
    (P*w % 128 == 0, or P == bc so the block equals the full array)."""
    def est_bytes(p):
        pw, po = p * w, p * ow
        return (2 * 2 * h * pw * itemsize          # double-buffered img1/img2 blocks
                + 4 * (8 * h * pw                  # f32 casts + products + fused concat
                       + 5 * oh * pw               # row-filtered T (OH, 5*P*W)
                       + 12 * oh * po              # filtered maps + SSIM temps + acc
                       + 2 * pw * po               # block-diag A_W^T
                       + oh * h))                  # A_H
    divisors = [d for d in range(bc, 0, -1) if bc % d == 0]
    aligned = [d for d in divisors if d == bc or (d * w) % 128 == 0]
    for p in aligned:
        if est_bytes(p) <= _VMEM_BUDGET:
            return p
    # TODO(synk): nothing aligned fits the budget -> large image; needs the
    # banded row-strip tiling described above.  Fall back to the smallest
    # aligned packing and rely on the raised vmem limit.
    return aligned[-1]


def _make_ssim_kernel(pw: int):
    """pw = P*W, the lane width of one packed image block."""

    def kernel(a_h_ref, bwt_ref, img1_ref, img2_ref, out_ref, acc_ref):
        # a_h_ref:  (OH, H)        banded row-filter matrix (resident)
        # bwt_ref:  (P*W, P*OW)    block-diagonal A_W^T (one A_W^T per packed plane)
        # img*_ref: (H, P*W)       P lane-packed planes, native dtype (pipelined)
        # out_ref:  (1, 1)         per-shard partial sum of the SSIM map
        # acc_ref:  (OH, P*OW) f32 running SSIM-map accumulator (VMEM scratch)
        j = pl.program_id(1)

        @pl.when(j == 0)
        def _init():
            acc_ref[...] = jnp.zeros_like(acc_ref)

        a_h = a_h_ref[...]
        bwt = bwt_ref[...]
        # Cast after the block lands in VMEM (inputs stream in native dtype).
        x1 = img1_ref[...].astype(jnp.float32)     # (H, P*W)
        x2 = img2_ref[...].astype(jnp.float32)

        # Fused row filter: all five maps for all P planes in ONE matmul,
        # MXU N dimension = 5*P*W lanes.
        x_cat = jnp.concatenate([x1, x2, x1 * x1, x2 * x2, x1 * x2], axis=1)
        t = jnp.dot(a_h, x_cat, preferred_element_type=jnp.float32)   # (OH, 5*P*W)

        # Column filter: one matmul per product against the plane-block-diagonal
        # A_W^T; planes stay packed along lanes (no per-plane loop).
        def col_filter(q):
            return jnp.dot(t[:, q * pw:(q + 1) * pw], bwt,
                           preferred_element_type=jnp.float32)        # (OH, P*OW)

        mu1, mu2, s11, s22, s12 = (col_filter(q) for q in range(5))

        mu1_sq = mu1 * mu1
        mu2_sq = mu2 * mu2
        mu1_mu2 = mu1 * mu2
        sigma1_sq = s11 - mu1_sq
        sigma2_sq = s22 - mu2_sq
        sigma12 = s12 - mu1_mu2

        v1 = 2.0 * sigma12 + _C2
        v2 = sigma1_sq + sigma2_sq + _C2
        num = (2.0 * mu1_mu2 + _C1) * v1
        den = (mu1_sq + mu2_sq + _C1) * v2
        # EUP reciprocal (free VLIW slot); ~1e-4 rel. error, negligible for a mean.
        ssim_map = num * pl.reciprocal(den, approx=True)

        # Accumulate the map (VPU add) -- no per-step XLU reduction.
        acc_ref[...] += ssim_map

        @pl.when(j == pl.num_programs(1) - 1)
        def _finalize():
            out_ref[...] = jnp.sum(acc_ref[...], keepdims=True)

    return kernel


def ssim_pallas(img1: jnp.ndarray, img2: jnp.ndarray,
                window_size: int = WINDOW_SIZE) -> jnp.ndarray:
    """SSIM(img1, img2), size_average=True; inputs are NCHW arrays."""
    assert img1.shape == img2.shape and img1.ndim == 4
    B, C, H, W = img1.shape
    bc = B * C
    K = min(window_size, H, W)   # matches real_size = min(window_size, height, width)
    OH, OW = H - K + 1, W - K + 1

    g = _gaussian_1d(K, SIGMA)
    P = _choose_planes_per_step(bc, H, W, OH, OW, jnp.dtype(img1.dtype).itemsize)
    steps = bc // P
    num_shards = 2 if (steps >= 2 and steps % 2 == 0) else 1   # v7x: 2 TCs
    steps_per_shard = steps // num_shards

    a_h = jnp.asarray(_banded_conv_matrix(OH, H, g))                     # (OH, H)
    a_w = _banded_conv_matrix(OW, W, g)                                  # (OW, W)
    bwt = jnp.asarray(_block_diag(a_w.T.copy(), P))                      # (P*W, P*OW)

    # One-time XLA relayout (layout plumbing): (B,C,H,W) -> (H, BC*W) so every
    # kernel DMA is a lane-dense 2-D slab and the kernel needs no per-step
    # transposes.  Native dtype is preserved; the f32 cast happens in-kernel.
    def pack(x):
        return jnp.transpose(x.reshape(bc, H, W), (1, 0, 2)).reshape(H, bc * W)

    x1p, x2p = pack(img1), pack(img2)
    inv_count = 1.0 / float(bc * OH * OW)

    partials = pl.pallas_call(
        _make_ssim_kernel(P * W),
        out_shape=jax.ShapeDtypeStruct((num_shards, 1), jnp.float32),
        grid_spec=pltpu.PrefetchScalarGridSpec(
            num_scalar_prefetch=0,
            grid=(num_shards, steps_per_shard),
            in_specs=[
                pl.BlockSpec((OH, H), lambda c, j: (0, 0)),          # A_H (resident)
                pl.BlockSpec((P * W, P * OW), lambda c, j: (0, 0)),  # blockdiag A_W^T
                pl.BlockSpec((H, P * W),
                             lambda c, j: (0, c * steps_per_shard + j)),  # img1 planes
                pl.BlockSpec((H, P * W),
                             lambda c, j: (0, c * steps_per_shard + j)),  # img2 planes
            ],
            out_specs=pl.BlockSpec((1, 1), lambda c, j: (c, 0)),
            scratch_shapes=[pltpu.VMEM((OH, P * OW), jnp.float32)],
        ),
        compiler_params=pltpu.CompilerParams(
            # Leading shard axis is parallel (megacore on v7x); the plane loop
            # carries the map accumulator -> arbitrary.
            dimension_semantics=("parallel", "arbitrary"),
            vmem_limit_bytes=32 * 1024 * 1024,
        ),
    )(a_h, bwt, x1p, x2p)

    return jnp.sum(partials) * inv_count


def ssim_reference(img1: jnp.ndarray, img2: jnp.ndarray,
                   window_size: int = WINDOW_SIZE) -> jnp.ndarray:
    """Pure-JAX reference mirroring the PyTorch module (padding=0, mean)."""
    B, C, H, W = img1.shape
    K = min(window_size, H, W)
    g = _gaussian_1d(K, SIGMA)
    a_h = jnp.asarray(_banded_conv_matrix(H - K + 1, H, g))
    a_w = jnp.asarray(_banded_conv_matrix(W - K + 1, W, g))
    hp = jax.lax.Precision.HIGHEST
    x1 = img1.astype(jnp.float32)
    x2 = img2.astype(jnp.float32)

    def filt(x):
        t = jnp.einsum('oh,bchw->bcow', a_h, x, precision=hp)
        return jnp.einsum('pw,bcow->bcop', a_w, t, precision=hp)

    mu1, mu2 = filt(x1), filt(x2)
    s11, s22, s12 = filt(x1 * x1), filt(x2 * x2), filt(x1 * x2)
    sigma1_sq = s11 - mu1 * mu1
    sigma2_sq = s22 - mu2 * mu2
    sigma12 = s12 - mu1 * mu2
    v1 = 2.0 * sigma12 + _C2
    v2 = sigma1_sq + sigma2_sq + _C2
    ssim_map = (2.0 * mu1 * mu2 + _C1) * v1 / ((mu1 * mu1 + mu2 * mu2 + _C1) * v2)
    return jnp.mean(ssim_map)


if __name__ == "__main__":
    key = jax.random.PRNGKey(0)
    k1, k2 = jax.random.split(key)
    B, C, H, W = 2, 4, 16, 16
    img1 = jax.random.uniform(k1, (B, C, H, W), dtype=jnp.float32)
    img2 = jax.random.uniform(k2, (B, C, H, W), dtype=jnp.float32)

    val = jax.block_until_ready(ssim_pallas(img1, img2))
    ref = jax.block_until_ready(ssim_reference(img1, img2))

    assert val.shape == () and bool(jnp.isfinite(val))
    assert abs(float(val) - float(ref)) < 2e-3, (float(val), float(ref))
    print("KERNEL_OK")
</pallas_src>

<mosaic_0001>
module attributes {stable_mosaic.version = 11 : i64} {
  func.func @kernel(%arg0: i32, %arg1: i32, %arg2: memref<6x16xf32, #tpu.memory_space<vmem>>, %arg3: memref<128x48xf32, #tpu.memory_space<vmem>>, %arg4: memref<16x128xf32, #tpu.memory_space<vmem>>, %arg5: memref<16x128xf32, #tpu.memory_space<vmem>>, %arg6: memref<1x1xf32, #tpu.memory_space<vmem>>, %arg7: memref<6x48xf32, #tpu.memory_space<vmem>>) attributes {dimension_semantics = [#tpu.dimension_semantics<parallel>, #tpu.dimension_semantics<arbitrary>], iteration_bounds = array<i64: 1, 1>, scalar_prefetch = 0 : i64, scratch_operands = 1 : i64, tpu.core_type = #tpu.core_type<tc>, window_params = [{pipeline_mode = #tpu.pipeline_mode<synchronous>, transform_indices = @transform_0, window_bounds = array<i64: 6, 16>}, {pipeline_mode = #tpu.pipeline_mode<synchronous>, transform_indices = @transform_1, window_bounds = array<i64: 128, 48>}, {transform_indices = @transform_2, window_bounds = array<i64: 16, 128>}, {transform_indices = @transform_3, window_bounds = array<i64: 16, 128>}, {transform_indices = @transform_4, window_bounds = array<i64: 1, 1>}]} {
    %c0_i32 = arith.constant 0 : i32
    %0 = arith.cmpi eq, %arg1, %c0_i32 : i32
    %1 = arith.extui %0 : i1 to i32
    %c0_i32_0 = arith.constant 0 : i32
    %2 = arith.cmpi ne, %1, %c0_i32_0 : i32
    scf.if %2 {
      %cst_25 = arith.constant 0.000000e+00 : f32
      %52 = vector.broadcast %cst_25 : f32 to vector<6x48xf32>
      %c0_26 = arith.constant 0 : index
      %c0_27 = arith.constant 0 : index
      %53 = vector.load %arg7[%c0_26, %c0_27] : memref<6x48xf32, #tpu.memory_space<vmem>>, vector<6x48xf32>
      tpu.vector_store %arg7[%c0_26, %c0_27], %52 {strides = array<i32>} : memref<6x48xf32, #tpu.memory_space<vmem>>, vector<6x48xf32>,
    } else {
    }
    %c0 = arith.constant 0 : index
    %c0_1 = arith.constant 0 : index
    %3 = vector.load %arg2[%c0, %c0_1] : memref<6x16xf32, #tpu.memory_space<vmem>>, vector<6x16xf32>
    %c0_2 = arith.constant 0 : index
    %c0_3 = arith.constant 0 : index
    %4 = vector.load %arg3[%c0_2, %c0_3] : memref<128x48xf32, #tpu.memory_space<vmem>>, vector<128x48xf32>
    %c0_4 = arith.constant 0 : index
    %c0_5 = arith.constant 0 : index
    %5 = vector.load %arg4[%c0_4, %c0_5] : memref<16x128xf32, #tpu.memory_space<vmem>>, vector<16x128xf32>
    %c0_6 = arith.constant 0 : index
    %c0_7 = arith.constant 0 : index
    %6 = vector.load %arg5[%c0_6, %c0_7] : memref<16x128xf32, #tpu.memory_space<vmem>>, vector<16x128xf32>
    %7 = arith.mulf %5, %5 : vector<16x128xf32>
    %8 = arith.mulf %6, %6 : vector<16x128xf32>
    %9 = arith.mulf %5, %6 : vector<16x128xf32>
    %10 = tpu.concatenate %5, %6, %7, %8, %9 in 1 : vector<16x128xf32>, vector<16x128xf32>, vector<16x128xf32>, vector<16x128xf32>, vector<16x128xf32> -> vector<16x640xf32>
    %cst = arith.constant dense<0.000000e+00> : vector<6x640xf32>
    %11 = tpu.matmul %3, %10, %cst {dimension_numbers = #tpu.dot_dimension_numbers<[1], [0], [0], [1], [0, 0, 1, 1], [], []>} : vector<6x16xf32>, vector<16x640xf32>, vector<6x640xf32> -> vector<6x640xf32>
    %12 = vector.extract_strided_slice %11 {offsets = [0, 0], sizes = [6, 128], strides = [1, 1]} : vector<6x640xf32> to vector<6x128xf32>
    %cst_8 = arith.constant dense<0.000000e+00> : vector<6x48xf32>
    %13 = tpu.matmul %12, %4, %cst_8 {dimension_numbers = #tpu.dot_dimension_numbers<[1], [0], [0], [1], [0, 0, 1, 1], [], []>} : vector<6x128xf32>, vector<128x48xf32>, vector<6x48xf32> -> vector<6x48xf32>
    %14 = vector.extract_strided_slice %11 {offsets = [0, 128], sizes = [6, 128], strides = [1, 1]} : vector<6x640xf32> to vector<6x128xf32>
    %cst_9 = arith.constant dense<0.000000e+00> : vector<6x48xf32>
    %15 = tpu.matmul %14, %4, %cst_9 {dimension_numbers = #tpu.dot_dimension_numbers<[1], [0], [0], [1], [0, 0, 1, 1], [], []>} : vector<6x128xf32>, vector<128x48xf32>, vector<6x48xf32> -> vector<6x48xf32>
    %16 = vector.extract_strided_slice %11 {offsets = [0, 256], sizes = [6, 128], strides = [1, 1]} : vector<6x640xf32> to vector<6x128xf32>
    %cst_10 = arith.constant dense<0.000000e+00> : vector<6x48xf32>
    %17 = tpu.matmul %16, %4, %cst_10 {dimension_numbers = #tpu.dot_dimension_numbers<[1], [0], [0], [1], [0, 0, 1, 1], [], []>} : vector<6x128xf32>, vector<128x48xf32>, vector<6x48xf32> -> vector<6x48xf32>
    %18 = vector.extract_strided_slice %11 {offsets = [0, 384], sizes = [6, 128], strides = [1, 1]} : vector<6x640xf32> to vector<6x128xf32>
    %cst_11 = arith.constant dense<0.000000e+00> : vector<6x48xf32>
    %19 = tpu.matmul %18, %4, %cst_11 {dimension_numbers = #tpu.dot_dimension_numbers<[1], [0], [0], [1], [0, 0, 1, 1], [], []>} : vector<6x128xf32>, vector<128x48xf32>, vector<6x48xf32> -> vector<6x48xf32>
    %20 = vector.extract_strided_slice %11 {offsets = [0, 512], sizes = [6, 128], strides = [1, 1]} : vector<6x640xf32> to vector<6x128xf32>
    %cst_12 = arith.constant dense<0.000000e+00> : vector<6x48xf32>
    %21 = tpu.matmul %20, %4, %cst_12 {dimension_numbers = #tpu.dot_dimension_numbers<[1], [0], [0], [1], [0, 0, 1, 1], [], []>} : vector<6x128xf32>, vector<128x48xf32>, vector<6x48xf32> -> vector<6x48xf32>
    %22 = arith.mulf %13, %13 : vector<6x48xf32>
    %23 = arith.mulf %15, %15 : vector<6x48xf32>
    %24 = arith.mulf %13, %15 : vector<6x48xf32>
    %25 = arith.subf %17, %22 : vector<6x48xf32>
    %26 = arith.subf %19, %23 : vector<6x48xf32>
    %27 = arith.subf %21, %24 : vector<6x48xf32>
    %cst_13 = arith.constant 2.000000e+00 : f32
    %28 = vector.broadcast %cst_13 : f32 to vector<6x48xf32>
    %29 = arith.mulf %28, %27 : vector<6x48xf32>
    %cst_14 = arith.constant 8.99999984E-4 : f32
    %30 = vector.broadcast %cst_14 : f32 to vector<6x48xf32>
    %31 = arith.addf %29, %30 : vector<6x48xf32>
    %32 = arith.addf %25, %26 : vector<6x48xf32>
    %cst_15 = arith.constant 8.99999984E-4 : f32
    %33 = vector.broadcast %cst_15 : f32 to vector<6x48xf32>
    %34 = arith.addf %32, %33 : vector<6x48xf32>
    %cst_16 = arith.constant 2.000000e+00 : f32
    %35 = vector.broadcast %cst_16 : f32 to vector<6x48xf32>
    %36 = arith.mulf %35, %24 : vector<6x48xf32>
    %cst_17 = arith.constant 9.99999974E-5 : f32
    %37 = vector.broadcast %cst_17 : f32 to vector<6x48xf32>
    %38 = arith.addf %36, %37 : vector<6x48xf32>
    %39 = arith.mulf %38, %31 : vector<6x48xf32>
    %40 = arith.addf %22, %23 : vector<6x48xf32>
    %cst_18 = arith.constant 9.99999974E-5 : f32
    %41 = vector.broadcast %cst_18 : f32 to vector<6x48xf32>
    %42 = arith.addf %40, %41 : vector<6x48xf32>
    %43 = arith.mulf %42, %34 : vector<6x48xf32>
    %44 = tpu.reciprocal %43 {approx = true} : vector<6x48xf32> -> vector<6x48xf32>
    %45 = arith.mulf %39, %44 : vector<6x48xf32>
    %c0_19 = arith.constant 0 : index
    %c0_20 = arith.constant 0 : index
    %46 = vector.load %arg7[%c0_19, %c0_20] : memref<6x48xf32, #tpu.memory_space<vmem>>, vector<6x48xf32>
    %47 = arith.addf %46, %45 : vector<6x48xf32>
    %c0_21 = arith.constant 0 : index
    %c0_22 = arith.constant 0 : index
    %48 = vector.load %arg7[%c0_21, %c0_22] : memref<6x48xf32, #tpu.memory_space<vmem>>, vector<6x48xf32>
    tpu.vector_store %arg7[%c0_21, %c0_22], %47 {strides = array<i32>} : memref<6x48xf32, #tpu.memory_space<vmem>>, vector<6x48xf32>,
    %c0_i32_23 = arith.constant 0 : i32
    %49 = arith.cmpi eq, %arg1, %c0_i32_23 : i32
    %50 = arith.extui %49 : i1 to i32
    %c0_i32_24 = arith.constant 0 : i32
    %51 = arith.cmpi ne, %50, %c0_i32_24 : i32
    scf.if %51 {
      %c0_25 = arith.constant 0 : index
      %c0_26 = arith.constant 0 : index
      %52 = vector.load %arg7[%c0_25, %c0_26] : memref<6x48xf32, #tpu.memory_space<vmem>>, vector<6x48xf32>
      %53 = vector.shape_cast %52 : vector<6x48xf32> to vector<1x6x48xf32>
      %cst_27 = arith.constant dense<0.000000e+00> : vector<1xf32>
      %54 = vector.multi_reduction <add>, %53, %cst_27 [1, 2] : vector<1x6x48xf32> to vector<1xf32>
      %55 = vector.shape_cast %54 : vector<1xf32> to vector<1x1x1xf32>
      %56 = vector.extract %55[0, 0, 0] : f32 from vector<1x1x1xf32>
      %57 = vector.broadcast %56 : f32 to vector<1x1xf32>
      %c0_28 = arith.constant 0 : index
      %c0_29 = arith.constant 0 : index
      %58 = vector.load %arg6[%c0_28, %c0_29] : memref<1x1xf32, #tpu.memory_space<vmem>>, vector<1x1xf32>
      tpu.vector_store %arg6[%c0_28, %c0_29], %57 {strides = array<i32>} : memref<1x1xf32, #tpu.memory_space<vmem>>, vector<1x1xf32>,
    } else {
    }
    return
  }
  func.func @transform_0(%arg0: i32, %arg1: i32) -> (i32, i32) {
    %c0_i32 = arith.constant 0 : i32
    %c0_i32_0 = arith.constant 0 : i32
    %c0_i32_1 = arith.constant 0 : i32
    return %c0_i32, %c0_i32_0 : i32, i32
  }
  func.func @transform_1(%arg0: i32, %arg1: i32) -> (i32, i32) {
    %c0_i32 = arith.constant 0 : i32
    %c0_i32_0 = arith.constant 0 : i32
    %c0_i32_1 = arith.constant 0 : i32
    return %c0_i32, %c0_i32_0 : i32, i32
  }
  func.func @transform_2(%arg0: i32, %arg1: i32) -> (i32, i32) {
    %c1_i32 = arith.constant 1 : i32
    %0 = arith.muli %arg0, %c1_i32 : i32
    %1 = arith.addi %0, %arg1 : i32
    %c0_i32 = arith.constant 0 : i32
    %c0_i32_0 = arith.constant 0 : i32
    return %c0_i32, %1 : i32, i32
  }
  func.func @transform_3(%arg0: i32, %arg1: i32) -> (i32, i32) {
    %c1_i32 = arith.constant 1 : i32
    %0 = arith.muli %arg0, %c1_i32 : i32
    %1 = arith.addi %0, %arg1 : i32
    %c0_i32 = arith.constant 0 : i32
    %c0_i32_0 = arith.constant 0 : i32
    return %c0_i32, %1 : i32, i32
  }
  func.func @transform_4(%arg0: i32, %arg1: i32) -> (i32, i32) {
    %c0_i32 = arith.constant 0 : i32
    %c0_i32_0 = arith.constant 0 : i32
    return %arg0, %c0_i32 : i32, i32
  }
}

</mosaic_0001>

<bundles_post_ra>
// kernel: tpu_custom_call.1
= control target key start
LH: loop header
LB: loop body
LE: loop exit
PB: predicated region body
PF: predicated region fallthrough
CT: control target
= control target key end

     0   :  { %v1152_v8 = vmov 0.0   ;;  %v1153_v12 = vmov 0.0|0.0   ;;  %vm85_vm0 = vcmask 130048   ;;  %vm1154_vm1 = vmmov 0   ;;  %s1374_s0 = inlined_call_operand.vmem [shape: f32[6,16], index: 0, kind: input, shape index: {}]   ;;  %s1375_s1 = inlined_call_operand.vmem [shape: f32[128,48], index: 1, kind: input, shape index: {}]   ;;  %s1376_s2 = inlined_call_operand.vmem [shape: f32[16,128], index: 2, kind: input, shape index: {}]   ;;  %s1377_s3 = inlined_call_operand.vmem [shape: f32[16,128], index: 3, kind: input, shape index: {}]   ;;  %s1378_s4 = inlined_call_operand.hbm [shape: f32[1,1], index: 4, kind: output, shape index: {}]  }
   0x1   :  { %v77_v0 = vld [vmem:[%s1377_s3] sm:$0xff]  ;;  %v78_v1 = vld [vmem:[%s1377_s3 + $0x8] sm:$0xff]  ;;  %153 = vmatprep.mubr.f32.mxu0 %v1152_v8  ;;  %1000 = vmatprep.subr.bf16.mxu1 %v1153_v12  ;;  %v61_v14 = vld [vmem:[%s1375_s1 + $0x10] sm:$0xff] }
   0x2   :  { %v75_v2 = vld [vmem:[%s1376_s2] sm:$0xff]  ;;  %v81_v3 = vmul.f32 %v77_v0, %v77_v0  ;;  %v82_v4 = vmul.f32 %v78_v1, %v78_v1  ;;  %v989_v5 = vpack.c.bf16 %v78_v1, %v77_v0  ;;  %v76_v6 = vld [vmem:[%s1376_s2 + $0x8] sm:$0xff]  ;;  %v62_v15 = vld [vmem:[%s1375_s1 + $0x18] sm:$0xff]  ;;  %846 = vmatprep.mubr.msk.f32.mxu1 %vm1154_vm1, %v1152_v8 }
   0x3   :  { %v79_v7 = vmul.f32 %v75_v2, %v75_v2  ;;  %v59_v9 = vld [vmem:[%s1375_s1] sm:$0xff]  ;;  %v80_v10 = vmul.f32 %v76_v6, %v76_v6  ;;  %v991_v11 = vpack.c.bf16 %v76_v6, %v75_v2  ;;  %v60_v13 = vld [vmem:[%s1375_s1 + $0x8] sm:$0xff]  ;;  %v83_v18 = vmul.f32 %v77_v0, %v75_v2 }
   0x4   :  { %990 = vmatprep.subr.bf16.mxu0 %v989_v5  ;;  %v993_v16 = vpack.c.bf16 %v82_v4, %v81_v3  ;;  %v1207_v17 = vpack.c.bf16 %v60_v13, %v59_v9  ;;  %v84_v19 = vmul.f32 %v78_v1, %v76_v6  ;;  %v58_v20 = vld [vmem:[%s1374_s0] sm:$0x3f]  ;;  %v1215_v22 = vpack.c.bf16 %v62_v15, %v61_v14  ;;  %v64_v24 = vld [vmem:[%s1375_s1 + $0x28] sm:$0xff] }
   0x5   :  { %992 = vmatpush1.bf16.msra.mxu0 %v991_v11  ;;  %v995_v21 = vpack.c.bf16 %v80_v10, %v79_v7  ;;  %v63_v23 = vld [vmem:[%s1375_s1 + $0x20] sm:$0xff] }
   0x6   :  { %994 = vmatprep.subr.bf16.mxu0 %v993_v16  ;;  %1002 = vmatpush3.bf16.msra.mxu1 %v1207_v17 }
   0x7   :  { %1003 = vmatprep.subr.bf16.mxu1 %v1153_v12 }
   0x8   :  { %716 = vmatmul.mubr.msk.f32.vlgmr.msra.gmra.mrb[0].mxu0 %vm85_vm0, %v58_v20 }
   0x9   :  { %9 = vsyncpa [#allocation4], 0  ;;  %996 = vmatpush1.bf16.msra.mxu0 %v995_v21  ;;  %224 = vmatprep.mubr.f32.mxu0 %v1152_v8  ;;  %v998_v25 = vpack.c.bf16 %v84_v19, %v83_v18  ;;  %v1228_v26 = vpack.c.bf16 %v64_v24, %v63_v23  ;;  %v65_v27 = vld [vmem:[%s1375_s1 + $0x30] sm:$0xff]  ;;  %v66_v28 = vld [vmem:[%s1375_s1 + $0x38] sm:$0xff]  ;;  %vm56_vm2 = vcmask 390144   ;;  %vm688_vm3 = vcmask 0  }
   0xa   :  { %997 = vmatprep.subr.bf16.mxu0 %v1153_v12  ;;  %1005 = vmatpush3.bf16.msra.mxu1 %v1215_v22  ;;  %v1242_v29 = vpack.c.bf16 %v66_v28, %v65_v27  ;;  %v67_v30 = vld [vmem:[%s1375_s1 + $0x40] sm:$0xff]  ;;  %v68_v31 = vld [vmem:[%s1375_s1 + $0x48] sm:$0xff]  ;;  %v69_v33 = vld [vmem:[%s1375_s1 + $0x50] sm:$0xff]  ;;  %57 = vst.msk [vmem:[#allocation2] sm:$0x3f] %vm56_vm2, %v1152_v8 }
   0xb   :  { %1006 = vmatprep.subr.bf16.mxu1 %v1153_v12  ;;  %v1257_v32 = vpack.c.bf16 %v68_v31, %v67_v30  ;;  %v70_v34 = vld [vmem:[%s1375_s1 + $0x58] sm:$0xff]  ;;  %v71_v36 = vld [vmem:[%s1375_s1 + $0x60] sm:$0xff]  ;;  %v72_v37 = vld [vmem:[%s1375_s1 + $0x68] sm:$0xff] }
   0xc   :  { %717 = vmatmul.mubr.msk.f32.vlgmr.msra.gmra.mrb[2].mxu0 %vm85_vm0, %v58_v20  ;;  %v1269_v35 = vpack.c.bf16 %v70_v34, %v69_v33  ;;  %v1281_v38 = vpack.c.bf16 %v72_v37, %v71_v36  ;;  %v73_v39 = vld [vmem:[%s1375_s1 + $0x70] sm:$0xff]  ;;  %v74_v40 = vld [vmem:[%s1375_s1 + $0x78] sm:$0xff]  ;;  %s1155_s1 = smov [#allocation3]  }
   0xd   :  { %999 = vmatpush3.bf16.msra.mxu0 %v998_v25  ;;  %811 = vmatprep.mubr.msk.f32.mxu0 %vm1154_vm1, %v1152_v8  ;;  %v1293_v41 = vpack.c.bf16 %v74_v40, %v73_v39  ;;  %s696_s27 = sshll.u32 %s1155_s1, 4  ;;  %s697_s27 = int_to_ptr.vmem [resolvable:$true] %s696_s27 }
   0xe   :  { %1024 = vmatprep.subr.bf16.mxu0 %v1153_v12  ;;  %1008 = vmatpush3.bf16.msra.mxu1 %v1228_v26  ;;  %s1128_s28 = scalar_lea.vmem %s697_s27, 16  ;;  %s1132_s29 = scalar_lea.vmem %s697_s27, 32 }
   0xf   :  { %1009 = vmatprep.subr.bf16.mxu1 %v1153_v12  ;;  %p1129_p0 = scmp.ne.s32.totalorder %s697_s27, %s1128_s28  ;;  %p1133_p1 = scmp.lt.s32.totalorder %s697_s27, %s697_s27 }
  0x10   :  { %812 = vmatmul.mubr.msk.f32.vlgmr.msra.gmra.mrb[4].mxu0 %vm85_vm0, %v58_v20  ;;  %p1134_p2 = scmp.lt.s32.totalorder %s1132_s29, %s1128_s28 }
  0x11   :  { %1026 = vmatpush3.bf16.msra.mxu0 %v1207_v17  ;;  %881 = vmatprep.mubr.msk.f32.mxu0 %vm1154_vm1, %v1152_v8  ;;  %v669_v11 = vld [vmem:[#allocation2] sm:$0x3f] }
  0x12   :  { %1027 = vmatprep.subr.bf16.mxu0 %v1153_v12  ;;  %1011 = vmatpush3.bf16.msra.mxu1 %v1242_v29  ;;  %p1135_p3 = por %p1134_p2, %p1133_p1 }
  0x13   :  { %1012 = vmatprep.subr.bf16.mxu1 %v1153_v12 }
  0x14   :  { %p1136_p4 = pnand %p1135_p3, %p1129_p0 }
  0x15   :  { %1029 = vmatpush3.bf16.msra.mxu0 %v1215_v22 }
  0x16   :  { %1030 = vmatprep.subr.bf16.mxu0 %v1153_v12  ;;  %1014 = vmatpush3.bf16.msra.mxu1 %v1257_v32 }
  0x17   :  { %1015 = vmatprep.subr.bf16.mxu1 %v1153_v12 }
  0x19   :  { %1032 = vmatpush3.bf16.msra.mxu0 %v1228_v26 }
  0x1a   :  { %1033 = vmatprep.subr.bf16.mxu0 %v1153_v12  ;;  %1017 = vmatpush3.bf16.msra.mxu1 %v1269_v35 }
  0x1b   :  { %1018 = vmatprep.subr.bf16.mxu1 %v1153_v12 }
  0x1d   :  { %1035 = vmatpush3.bf16.msra.mxu0 %v1242_v29 }
  0x1e   :  { %1036 = vmatprep.subr.bf16.mxu0 %v1153_v12  ;;  %1020 = vmatpush3.bf16.msra.mxu1 %v1281_v38 }
  0x1f   :  { %1021 = vmatprep.subr.bf16.mxu1 %v1153_v12 }
  0x21   :  { %1038 = vmatpush3.bf16.msra.mxu0 %v1257_v32 }
  0x22   :  { %1039 = vmatprep.subr.bf16.mxu0 %v1153_v12  ;;  %1023 = vmatpush3.bf16.msra.mxu1 %v1293_v41 }
  0x23   :  { %1048 = vmatprep.subr.bf16.mxu1 %v1153_v12 }
  0x25   :  { %1041 = vmatpush3.bf16.msra.mxu0 %v1269_v35 }
  0x26   :  { %1042 = vmatprep.subr.bf16.mxu0 %v1153_v12 }
  0x29   :  { %1044 = vmatpush3.bf16.msra.mxu0 %v1281_v38 }
  0x2a   :  { %1045 = vmatprep.subr.bf16.mxu0 %v1153_v12 }
  0x2d   :  { %1047 = vmatpush3.bf16.msra.mxu0 %v1293_v41 }
  0x2e   :  { %1072 = vmatprep.subr.bf16.mxu0 %v1153_v12 }
  0xdb   :  { %v155_v42 = vpop.f32.mrb[0].mxu0 }
  0xdc   :  { %v157_v43 = vpop.f32.mrb[1].mxu0  ;;  %847 = vmatmul.mubr.f32.vlgmr.msra.gmra.mrb[0].mxu1 %v155_v42 }
  0xdd   :  { %1050 = vmatpush3.bf16.msra.mxu1 %v1207_v17  ;;  %882 = vmatmul.mubr.f32.vlgmr.msra.gmra.mrb[6].mxu0 %v157_v43 }
  0xde   :  { %1074 = vmatpush3.bf16.msra.mxu0 %v1207_v17  ;;  %1051 = vmatprep.subr.bf16.mxu1 %v1153_v12 }
  0xdf   :  { %1075 = vmatprep.subr.bf16.mxu0 %v1153_v12  ;;  %v226_v44 = vpop.f32.mrb[2].mxu0  ;;  %916 = vmatprep.mubr.msk.f32.mxu1 %vm1154_vm1, %v1152_v8 }
  0xe0   :  { %v228_v45 = vpop.f32.mrb[3].mxu0  ;;  %951 = vmatprep.mubr.msk.f32.mxu0 %vm1154_vm1, %v1152_v8 }
  0xe1   :  { %1053 = vmatpush3.bf16.msra.mxu1 %v1215_v22 }
  0xe2   :  { %1077 = vmatpush3.bf16.msra.mxu0 %v1215_v22  ;;  %1054 = vmatprep.subr.bf16.mxu1 %v1153_v12 }
  0xe3   :  { %1078 = vmatprep.subr.bf16.mxu0 %v1153_v12  ;;  %v297_v46 = vpop.f32.mrb[4].mxu0 }
  0xe4   :  { %v813_v47 = vpop.f32.mrb[5].mxu0 }
  0xe5   :  { %1056 = vmatpush3.bf16.msra.mxu1 %v1228_v26 }
  0xe6   :  { %1080 = vmatpush3.bf16.msra.mxu0 %v1228_v26  ;;  %1057 = vmatprep.subr.bf16.mxu1 %v1153_v12 }
  0xe7   :  { %1081 = vmatprep.subr.bf16.mxu0 %v1153_v12 }
  0xe9   :  { %1059 = vmatpush3.bf16.msra.mxu1 %v1242_v29 }
  0xea   :  { %1083 = vmatpush3.bf16.msra.mxu0 %v1242_v29  ;;  %1060 = vmatprep.subr.bf16.mxu1 %v1153_v12 }
  0xeb   :  { %1084 = vmatprep.subr.bf16.mxu0 %v1153_v12 }
  0xed   :  { %1062 = vmatpush3.bf16.msra.mxu1 %v1257_v32 }
  0xee   :  { %1086 = vmatpush3.bf16.msra.mxu0 %v1257_v32  ;;  %1063 = vmatprep.subr.bf16.mxu1 %v1153_v12 }
  0xef   :  { %1087 = vmatprep.subr.bf16.mxu0 %v1153_v12 }
  0xf1   :  { %1065 = vmatpush3.bf16.msra.mxu1 %v1269_v35 }
  0xf2   :  { %1089 = vmatpush3.bf16.msra.mxu0 %v1269_v35  ;;  %1066 = vmatprep.subr.bf16.mxu1 %v1153_v12 }
  0xf3   :  { %1090 = vmatprep.subr.bf16.mxu0 %v1153_v12 }
  0xf5   :  { %1068 = vmatpush3.bf16.msra.mxu1 %v1281_v38 }
  0xf6   :  { %1092 = vmatpush3.bf16.msra.mxu0 %v1281_v38  ;;  %1069 = vmatprep.subr.bf16.mxu1 %v1153_v12 }
  0xf7   :  { %1093 = vmatprep.subr.bf16.mxu0 %v1153_v12 }
  0xf9   :  { %1071 = vmatpush3.bf16.msra.mxu1 %v1293_v41 }
  0xfa   :  { %1095 = vmatpush3.bf16.msra.mxu0 %v1293_v41  ;;  %1096 = vmatprep.subr.bf16.mxu1 %v1153_v12 }
  0xfc   :  { %917 = vmatmul.mubr.f32.vlgmr.msra.gmra.mrb[2].mxu1 %v226_v44 }
  0xfd   :  { %952 = vmatmul.mubr.f32.vlgmr.msra.gmra.mrb[8].mxu0 %v228_v45  ;;  %1098 = vmatpush3.bf16.msra.mxu1 %v1207_v17 }
  0xfe   :  { %1099 = vmatprep.subr.bf16.mxu1 %v1153_v12  ;;  %986 = vmatprep.mubr.msk.f32.mxu1 %vm1154_vm1, %v1152_v8 }
 0x101   :  { %1101 = vmatpush3.bf16.msra.mxu1 %v1215_v22 }
 0x102   :  { %1102 = vmatprep.subr.bf16.mxu1 %v1153_v12 }
 0x105   :  { %1104 = vmatpush3.bf16.msra.mxu1 %v1228_v26 }
 0x106   :  { %1105 = vmatprep.subr.bf16.mxu1 %v1153_v12 }
 0x109   :  { %1107 = vmatpush3.bf16.msra.mxu1 %v1242_v29 }
 0x10a   :  { %1108 = vmatprep.subr.bf16.mxu1 %v1153_v12 }
 0x10d   :  { %1110 = vmatpush3.bf16.msra.mxu1 %v1257_v32 }
 0x10e   :  { %1111 = vmatprep.subr.bf16.mxu1 %v1153_v12 }
 0x111   :  { %1113 = vmatpush3.bf16.msra.mxu1 %v1269_v35 }
 0x112   :  { %1114 = vmatprep.subr.bf16.mxu1 %v1153_v12 }
 0x115   :  { %1116 = vmatpush3.bf16.msra.mxu1 %v1281_v38 }
 0x116   :  { %1117 = vmatprep.subr.bf16.mxu1 %v1153_v12 }
 0x119   :  { %1119 = vmatpush3.bf16.msra.mxu1 %v1293_v41 }
 0x11c   :  { %987 = vmatmul.mubr.f32.vlgmr.msra.gmra.mrb[4].mxu1 %v297_v46 }
 0x1af   :  { %v367_v48 = vpop.f32.mrb[0].mxu1 }
 0x1b0   :  { %v651_v49 = vmul.f32 %v367_v48, %v367_v48  ;;  %v848_v50 = vpop.f32.mrb[1].mxu1  ;;  %v437_v51 = vpop.f32.mrb[6].mxu0 }
 0x1b1   :  { %v652_v52 = vmul.f32 %v437_v51, %v437_v51  ;;  %v653_v53 = vmul.f32 %v437_v51, %v367_v48  ;;  %v883_v54 = vpop.f32.mrb[7].mxu0 }
 0x1b3   :  { %v664_v55 = vadd.f32 %v652_v52, %v651_v49  ;;  %v661_v3 = vmul.f32 2.0, %v653_v53 }
 0x1b5   :  { %v665_v63 = vadd.f32 0.0001, %v664_v55  ;;  %v662_v7 = vadd.f32 0.0001, %v661_v3 }
 0x1cf   :  { %v507_v56 = vpop.f32.mrb[2].mxu1 }
 0x1d0   :  { %v654_v57 = vsub.f32 %v507_v56, %v651_v49  ;;  %v918_v58 = vpop.f32.mrb[3].mxu1  ;;  %v577_v59 = vpop.f32.mrb[8].mxu0 }
 0x1d1   :  { %v655_v60 = vsub.f32 %v577_v59, %v652_v52  ;;  %v953_v61 = vpop.f32.mrb[9].mxu0 }
 0x1d3   :  { %v659_v62 = vadd.f32 %v655_v60, %v654_v57 }
 0x1d5   :  { %v660_v0 = vadd.f32 0.0009, %v659_v62 }
 0x1d7   :  { %v666_v1 = vmul.f32 %v665_v63, %v660_v0 }
 0x1d9   :  { %1126 = vrcp.f32 %v666_v1 }
 0x1e3   :  { %v1127_v10 = vpop.eup %1126 }
 0x1ef   :  { %v647_v2 = vpop.f32.mrb[4].mxu1 }
 0x1f0   :  { %v656_v4 = vsub.f32 %v647_v2, %v653_v53  ;;  %v988_v5 = vpop.f32.mrb[5].mxu1 }
 0x1f2   :  { %v657_v6 = vmul.f32 2.0, %v656_v4 }
 0x1f4   :  { %v658_v8 = vadd.f32 0.0009, %v657_v6 }
 0x1f6   :  { %v663_v9 = vmul.f32 %v662_v7, %v658_v8 }
 0x1f8   :  { %v668_v12 = vmul.f32 %v1127_v10, %v663_v9 }
 0x1fa   :  { %v670_v13 = vadd.f32 %v669_v11, %v668_v12 }
 0x1fc   :  { %672 = vst.msk [vmem:[#allocation2] sm:$0x3f] %vm56_vm2, %v670_v13 }
 0x203   :  { %v676_v14 = vld [vmem:[#allocation2] sm:$0x3f] }
 0x204   :  { %v677_v15 = vsel %vm56_vm2, %v676_v14, 0.0 }
 0x205   :  { %678 = vadd.xlane.f32.xlu0 %v677_v15 }
 0x292   :  { %v679_v16 = vpop.xlane.xlu0 %678 }
 0x293   :  { %v680_v17 = vrot.slane %v679_v16, 4 }
 0x295   :  { %v681_v18 = vadd.f32 %v680_v17, %v679_v16 }
 0x297   :  { %v682_v19 = vrot.slane %v681_v18, 2 }
 0x299   :  { %v683_v20 = vadd.f32 %v682_v19, %v681_v18 }
 0x29b   :  { %v684_v21 = vrot.slane %v683_v20, 1 }
 0x29d   :  { %v685_v22 = vadd.f32 %v684_v21, %v683_v20 }
 0x29f   :  { %1120 = vpush %v685_v22 }
 0x2d0   :  { %s1121_s2 = spop %1120 }
 0x2d1   :  { %v687_v23 = vstv %s1121_s2 }
 0x2d2   :  { %689 = vst.msk [vmem:[#allocation3] sm:$0x1] %vm688_vm3, %v687_v23 }
 0x2d3   :  { %1139 = shalt.err (!%p1136_p4)
}
 0x2d4   :  { %s1140_s6 = scalar_lea.hbm %s1378_s4, 16 }
 0x2d5   :  { %p1141_p5 = scmp.ne.s32.totalorder %s1378_s4, %s1140_s6  ;;  %p1144_p6 = scmp.lt.u32.totalorder %s1140_s6, %s1378_s4 }
 0x2d7   :  { %p1146_p7 = pnand %p1144_p6, %p1141_p5 }
 0x2d9   :  { %1149 = shalt.err (!%p1146_p7)
}
 0x2da   :  { %699 = dma.vmem_to_hbm [thread:$0]  %s697_s27, 16, %s1378_s4, [#allocation4]  }
 0x2db   :  { %1150 = dma.done.wait [#allocation4], 16  }
 0x2dc   :  { %1151 = vsyncadd [#allocation4], 4294967280 }
 0x2dd   :  { %703 = vsyncpa [#allocation4], 1 }

</bundles_post_ra>
